<compile_context>
chip_gen: v7x
topology: tpu7x:2x2x1
jax: 0.10.0
libtpu: 0.0.40
codegen_flags: <defaults>
</compile_context>

<pallas_src>
import math

import jax
import jax.numpy as jnp
from jax.experimental import pallas as pl
from jax.experimental.pallas import tpu as pltpu


def _round_up(x, m):
    return (x + m - 1) // m * m


def _choose_tm(n, h_pad):
    """Largest sublane-aligned row tile whose working set stays well inside the
    default ~32 MiB scoped VMEM (v7x only has 64 MiB physical, leave headroom)."""
    budget = 16 * 1024 * 1024
    for tm in (512, 256, 128, 64, 32, 16, 8):
        n_pad = _round_up(n, tm)
        vmem = (2 * tm * n_pad * 2        # A tile, bf16, double-buffered
                + 2 * n_pad * h_pad * 2   # E (grid-invariant; budget 2 bufs)
                + 2 * h_pad * h_pad * 2   # W_r^T tile, bf16, double-buffered
                + tm * h_pad * 4          # resident f32 output / accumulator
                + 2 * tm * 4 * 2)         # inv-degree tile
        if vmem <= budget:
            return tm
    return 8


def _rgcn_kernel(a_ref, inv_ref, e_ref, wt_ref, o_ref):
    ri = pl.program_id(1)

    @pl.when(ri == 0)
    def _():
        o_ref[...] = jnp.zeros_like(o_ref)

    # message passing: M = A_r[row tile] @ E     (bf16 MXU, f32 accumulate)
    m = jnp.dot(a_ref[0], e_ref[...], preferred_element_type=jnp.float32)
    # row normalisation applied to the (tm, h) result, not the (tm, n) tile
    m = m * inv_ref[0]
    # per-relation mix: M @ W_r^T (W pre-transposed in the wrapper), reduced
    # over relations directly into the resident output block
    o_ref[...] += jnp.dot(m.astype(wt_ref.dtype), wt_ref[0],
                          preferred_element_type=jnp.float32)

    @pl.when(ri == pl.num_programs(1) - 1)
    def _():
        # output.sum(dim=1) already folded into o_ref; apply ReLU in place
        o_ref[...] = jnp.maximum(o_ref[...], 0.0)


def simple_rgcn_forward(cflat, embeddings, weights, *, tm=None):
    """cflat: (E, 3) int32 rows [s, p, o] in batch coordinates.
    embeddings: (n, hfr) float32.  weights: (r, hfr, hto) float32 (hfr == hto,
    as required by the reference einsum)."""
    n, h = embeddings.shape
    r = weights.shape[0]
    s, p, o = cflat[:, 0], cflat[:, 1], cflat[:, 2]

    h_pad = _round_up(h, 128)            # lane-dense stores, full MXU tiles
    if tm is None:
        tm = _choose_tm(n, h_pad)
    n_pad = _round_up(max(n, tm), tm)    # tm is a multiple of 8 -> sublane OK

    # Glue: densify the sparse edge structure (scatter-add has no clean Pallas
    # equivalent on TPU).  The degree scatter doubles as the row normaliser.
    a = jnp.zeros((r, n_pad, n_pad), jnp.float32).at[p, s, o].add(1.0)
    deg = jnp.zeros((r, n_pad), jnp.float32).at[p, s].add(1.0)
    inv = jnp.where(deg > 0.0, 1.0 / deg, 0.0)[..., None]        # (r, n_pad, 1)

    # bf16 operands for the MXU (edge counts are small integers -> exact).
    a = a.astype(jnp.bfloat16)
    e = jnp.zeros((n_pad, h_pad), jnp.bfloat16).at[:n, :h].set(
        embeddings.astype(jnp.bfloat16))
    wt = jnp.zeros((r, h_pad, h_pad), jnp.bfloat16).at[:, :h, :h].set(
        jnp.transpose(weights, (0, 2, 1)).astype(jnp.bfloat16))

    flops = 2 * r * n_pad * h_pad * (n_pad + h_pad)
    bytes_accessed = (a.size * 2 + inv.size * 4 + e.size * 2 + wt.size * 2
                      + n_pad * h_pad * 4)

    out = pl.pallas_call(
        _rgcn_kernel,
        out_shape=jax.ShapeDtypeStruct((n_pad, h_pad), jnp.float32),
        grid_spec=pltpu.PrefetchScalarGridSpec(
            num_scalar_prefetch=0,
            grid=(n_pad // tm, r),
            in_specs=[
                # per-relation row tile of the adjacency
                pl.BlockSpec((1, tm, n_pad), lambda ti, ri: (ri, ti, 0)),
                # matching inverse-degree column
                pl.BlockSpec((1, tm, 1), lambda ti, ri: (ri, ti, 0)),
                # embeddings: grid-invariant (pipeline_mode=pl.Buffered(1)
                # would reclaim its second buffer; left default for safety)
                pl.BlockSpec((n_pad, h_pad), lambda ti, ri: (0, 0)),
                # pre-transposed per-relation weights
                pl.BlockSpec((1, h_pad, h_pad), lambda ti, ri: (ri, 0, 0)),
            ],
            out_specs=pl.BlockSpec((tm, h_pad), lambda ti, ri: (ti, 0)),
        ),
        compiler_params=pltpu.CompilerParams(
            dimension_semantics=("parallel", "arbitrary")),
        cost_estimate=pl.CostEstimate(
            flops=flops, transcendentals=0, bytes_accessed=bytes_accessed),
    )(a, inv, e, wt)

    return out[:n, :h]


def _reference(cflat, embeddings, weights):
    """Pure-JAX (f32) transcription of SimpleRGCN.forward (default flags)."""
    n, h = embeddings.shape
    r = weights.shape[0]
    s, p, o = cflat[:, 0], cflat[:, 1], cflat[:, 2]
    fr = s + n * p
    counts = jnp.zeros((r * n,), jnp.float32).at[fr].add(1.0)
    values = 1.0 / counts[fr]
    out = jnp.zeros((r * n, h), jnp.float32).at[fr].add(values[:, None] * embeddings[o])
    out = out.reshape(r, n, h)
    out = jnp.einsum('rij,rnj->nri', weights, out).sum(axis=1)
    return jax.nn.relu(out)


if __name__ == "__main__":
    n, h, r, num_edges = 16, 32, 3, 40   # n nodes, hfr == hto == h, r relations

    key = jax.random.PRNGKey(0)
    k_s, k_p, k_o, k_e, k_w = jax.random.split(key, 5)

    # synthetic batch edge list (s, p, o) in batch coordinates
    s_idx = jax.random.randint(k_s, (num_edges,), 0, n, dtype=jnp.int32)
    p_idx = jax.random.randint(k_p, (num_edges,), 0, r, dtype=jnp.int32)
    o_idx = jax.random.randint(k_o, (num_edges,), 0, n, dtype=jnp.int32)
    cflat = jnp.stack([s_idx, p_idx, o_idx], axis=1)

    # batch.embeddings()
    embeddings = jax.random.normal(k_e, (n, h), dtype=jnp.float32)

    # self.weights: (r, hfr, hto), xavier_uniform with gain = calculate_gain('relu')
    gain = math.sqrt(2.0)
    bound = gain * math.sqrt(6.0 / (h + h))
    weights = jax.random.uniform(k_w, (r, h, h), minval=-bound, maxval=bound,
                                 dtype=jnp.float32)

    # tm=8 exercises the tiled (parallel) node axis even at this tiny size
    out = simple_rgcn_forward(cflat, embeddings, weights, tm=8)
    out = jax.block_until_ready(out)

    ref = _reference(cflat, embeddings, weights)
    assert out.shape == (n, h)
    # bf16 MXU path -> loosened tolerance vs the f32 reference
    assert jnp.allclose(out, ref, atol=1e-1, rtol=5e-2), "mismatch vs reference"

    print("KERNEL_OK")
</pallas_src>

<mosaic_0001>
module attributes {stable_mosaic.version = 11 : i64} {
  func.func @_rgcn_kernel(%arg0: i32, %arg1: i32, %arg2: memref<1x8x16xbf16, #tpu.memory_space<vmem>>, %arg3: memref<1x8x1xf32, #tpu.memory_space<vmem>>, %arg4: memref<16x128xbf16, #tpu.memory_space<vmem>>, %arg5: memref<1x128x128xbf16, #tpu.memory_space<vmem>>, %arg6: memref<8x128xf32, #tpu.memory_space<vmem>>) attributes {dimension_semantics = [#tpu.dimension_semantics<parallel>, #tpu.dimension_semantics<arbitrary>], iteration_bounds = array<i64: 2, 3>, scalar_prefetch = 0 : i64, scratch_operands = 0 : i64, tpu.core_type = #tpu.core_type<tc>, window_params = [{transform_indices = @transform_0, window_bounds = array<i64: 1, 8, 16>}, {transform_indices = @transform_1, window_bounds = array<i64: 1, 8, 1>}, {pipeline_mode = #tpu.pipeline_mode<synchronous>, transform_indices = @transform_2, window_bounds = array<i64: 16, 128>}, {transform_indices = @transform_3, window_bounds = array<i64: 1, 128, 128>}, {transform_indices = @transform_4, window_bounds = array<i64: 8, 128>}]} {
    %c0_i32 = arith.constant 0 : i32
    %0 = arith.cmpi eq, %arg1, %c0_i32 : i32
    %1 = arith.extui %0 : i1 to i32
    %c0_i32_0 = arith.constant 0 : i32
    %2 = arith.cmpi ne, %1, %c0_i32_0 : i32
    scf.if %2 {
      %cst_17 = arith.constant 0.000000e+00 : f32
      %21 = vector.broadcast %cst_17 : f32 to vector<8x128xf32>
      %c0_18 = arith.constant 0 : index
      %c0_19 = arith.constant 0 : index
      %22 = vector.load %arg6[%c0_18, %c0_19] : memref<8x128xf32, #tpu.memory_space<vmem>>, vector<8x128xf32>
      tpu.vector_store %arg6[%c0_18, %c0_19], %21 {strides = array<i32>} : memref<8x128xf32, #tpu.memory_space<vmem>>, vector<8x128xf32>,
    } else {
    }
    %c0 = arith.constant 0 : index
    %c0_1 = arith.constant 0 : index
    %c0_2 = arith.constant 0 : index
    %3 = vector.load %arg2[%c0, %c0_1, %c0_2] : memref<1x8x16xbf16, #tpu.memory_space<vmem>>, vector<1x8x16xbf16>
    %4 = vector.shape_cast %3 : vector<1x8x16xbf16> to vector<8x16xbf16>
    %c0_3 = arith.constant 0 : index
    %c0_4 = arith.constant 0 : index
    %5 = vector.load %arg4[%c0_3, %c0_4] : memref<16x128xbf16, #tpu.memory_space<vmem>>, vector<16x128xbf16>
    %cst = arith.constant dense<0.000000e+00> : vector<8x128xf32>
    %6 = tpu.matmul %4, %5, %cst {dimension_numbers = #tpu.dot_dimension_numbers<[1], [0], [0], [1], [0, 0, 1, 1], [], []>} : vector<8x16xbf16>, vector<16x128xbf16>, vector<8x128xf32> -> vector<8x128xf32>
    %c0_5 = arith.constant 0 : index
    %c0_6 = arith.constant 0 : index
    %c0_7 = arith.constant 0 : index
    %7 = vector.load %arg3[%c0_5, %c0_6, %c0_7] : memref<1x8x1xf32, #tpu.memory_space<vmem>>, vector<1x8x1xf32>
    %8 = vector.shape_cast %7 : vector<1x8x1xf32> to vector<8x1xf32>
    %9 = vector.broadcast %8 : vector<8x1xf32> to vector<8x128xf32>
    %10 = arith.mulf %6, %9 : vector<8x128xf32>
    %c0_8 = arith.constant 0 : index
    %c0_9 = arith.constant 0 : index
    %11 = vector.load %arg6[%c0_8, %c0_9] : memref<8x128xf32, #tpu.memory_space<vmem>>, vector<8x128xf32>
    %12 = arith.truncf %10 : vector<8x128xf32> to vector<8x128xbf16>
    %c0_10 = arith.constant 0 : index
    %c0_11 = arith.constant 0 : index
    %c0_12 = arith.constant 0 : index
    %13 = vector.load %arg5[%c0_10, %c0_11, %c0_12] : memref<1x128x128xbf16, #tpu.memory_space<vmem>>, vector<1x128x128xbf16>
    %14 = vector.shape_cast %13 : vector<1x128x128xbf16> to vector<128x128xbf16>
    %cst_13 = arith.constant dense<0.000000e+00> : vector<8x128xf32>
    %15 = tpu.matmul %12, %14, %cst_13 {dimension_numbers = #tpu.dot_dimension_numbers<[1], [0], [0], [1], [0, 0, 1, 1], [], []>} : vector<8x128xbf16>, vector<128x128xbf16>, vector<8x128xf32> -> vector<8x128xf32>
    %16 = arith.addf %11, %15 : vector<8x128xf32>
    %c0_14 = arith.constant 0 : index
    %c0_15 = arith.constant 0 : index
    %17 = vector.load %arg6[%c0_14, %c0_15] : memref<8x128xf32, #tpu.memory_space<vmem>>, vector<8x128xf32>
    tpu.vector_store %arg6[%c0_14, %c0_15], %16 {strides = array<i32>} : memref<8x128xf32, #tpu.memory_space<vmem>>, vector<8x128xf32>,
    %c2_i32 = arith.constant 2 : i32
    %18 = arith.cmpi eq, %arg1, %c2_i32 : i32
    %19 = arith.extui %18 : i1 to i32
    %c0_i32_16 = arith.constant 0 : i32
    %20 = arith.cmpi ne, %19, %c0_i32_16 : i32
    scf.if %20 {
      %c0_17 = arith.constant 0 : index
      %c0_18 = arith.constant 0 : index
      %21 = vector.load %arg6[%c0_17, %c0_18] : memref<8x128xf32, #tpu.memory_space<vmem>>, vector<8x128xf32>
      %cst_19 = arith.constant 0.000000e+00 : f32
      %22 = vector.broadcast %cst_19 : f32 to vector<8x128xf32>
      %23 = arith.maximumf %21, %22 : vector<8x128xf32>
      %c0_20 = arith.constant 0 : index
      %c0_21 = arith.constant 0 : index
      %24 = vector.load %arg6[%c0_20, %c0_21] : memref<8x128xf32, #tpu.memory_space<vmem>>, vector<8x128xf32>
      tpu.vector_store %arg6[%c0_20, %c0_21], %23 {strides = array<i32>} : memref<8x128xf32, #tpu.memory_space<vmem>>, vector<8x128xf32>,
    } else {
    }
    return
  }
  func.func @transform_0(%arg0: i32, %arg1: i32) -> (i32, i32, i32) {
    %c0_i32 = arith.constant 0 : i32
    %c0_i32_0 = arith.constant 0 : i32
    return %arg1, %arg0, %c0_i32 : i32, i32, i32
  }
  func.func @transform_1(%arg0: i32, %arg1: i32) -> (i32, i32, i32) {
    %c0_i32 = arith.constant 0 : i32
    %c0_i32_0 = arith.constant 0 : i32
    return %arg1, %arg0, %c0_i32 : i32, i32, i32
  }
  func.func @transform_2(%arg0: i32, %arg1: i32) -> (i32, i32) {
    %c0_i32 = arith.constant 0 : i32
    %c0_i32_0 = arith.constant 0 : i32
    %c0_i32_1 = arith.constant 0 : i32
    return %c0_i32, %c0_i32_0 : i32, i32
  }
  func.func @transform_3(%arg0: i32, %arg1: i32) -> (i32, i32, i32) {
    %c0_i32 = arith.constant 0 : i32
    %c0_i32_0 = arith.constant 0 : i32
    %c0_i32_1 = arith.constant 0 : i32
    return %arg1, %c0_i32, %c0_i32_0 : i32, i32, i32
  }
  func.func @transform_4(%arg0: i32, %arg1: i32) -> (i32, i32) {
    %c0_i32 = arith.constant 0 : i32
    %c0_i32_0 = arith.constant 0 : i32
    return %arg0, %c0_i32 : i32, i32
  }
}

</mosaic_0001>

<bundles_post_ra>
// kernel: tpu_custom_call.1
= control target key start
LH: loop header
LB: loop body
LE: loop exit
PB: predicated region body
PF: predicated region fallthrough
CT: control target
= control target key end

     0   :  { %s1222_s0 = inlined_call_operand.vmem [shape: bf16[3,16,16], index: 0, kind: input, shape index: {}]   ;;  %s1223_s1 = inlined_call_operand.vmem [shape: f32[3,16,1], index: 1, kind: input, shape index: {}]   ;;  %s1224_s2 = inlined_call_operand.vmem [shape: bf16[16,128], index: 2, kind: input, shape index: {}]   ;;  %s1225_s3 = inlined_call_operand.hbm [shape: bf16[3,128,128], index: 3, kind: input, shape index: {}]   ;;  %s1226_s4 = inlined_call_operand.hbm [shape: f32[16,128], index: 4, kind: output, shape index: {}]  }
   0x1   :  { %1232 = sst [smem:[#allocation13_spill]] %s1225_s3 }
   0x2   :  { %9 = vsyncpa [#allocation3], 0 }
   0x3   :  { %11 = vsyncpa [#allocation3 + $0x1], 0 }
   0x4   :  { %12 = vsyncpa [#allocation4], 0 }
   0x5   :  { %14 = vsyncpa [#allocation4 + $0x1], 0  ;;  %s975_s15 = smov 0   ;;  %s977_s16 = smov 0  }
   0x6   :  { %s979_s17 = smov 0   ;;  %s981_s18 = smov 0  }
   0x7   :  { %s983_s19 = smov 0   ;;  %s985_s20 = smov 0  }
   0x8   :  { %s987_s21 = smov 0   ;;  %s989_s22 = smov 0  }
   0x9   :  { %s991_s23 = smov 0   ;;  %s993_s24 = smov 0  }
   0xa   :  { %s995_s25 = smov 0  }
   0xb LB: > { %1233 = sst [smem:[#allocation8_spill]] %s932_s23  ;;  %s602_s26 = sadd.s32 4294967295, %s940_s25   ;;  %s940_s25 = sphi %s995_s25, %s20_s25   ;;  %s936_s24 = sphi %s993_s24, %s1250_s24   ;;  %s932_s23 = sphi %s991_s23, %s1249_s23   ;;  %s928_s22 = sphi %s989_s22, %s1248_s22   ;;  %s924_s21 = sphi %s987_s21, %s1247_s21   ;;  %s920_s20 = sphi %s985_s20, %s1256_s20   ;;  %s916_s19 = sphi %s983_s19, %s1255_s19   ;;  %s912_s18 = sphi %s981_s18, %s1254_s18   ;;  %s908_s17 = sphi %s979_s17, %s1253_s17   ;;  %s904_s16 = sphi %s977_s16, %s1252_s16   ;;  %s900_s15 = sphi %s975_s15, %s1251_s15  }
   0xc   : > { %1234 = sst [smem:[#allocation9_spill]] %s936_s24  ;;  %s603_s27 = sadd.s32 4294967294, %s940_s25  }
   0xd   : > { %s29_s28 = sadd.s32 1, %s932_s23  ;;  %s32_s29 = sadd.s32 1, %s936_s24 }
   0xe   : > { %p30_p0 = scmp.ge.s32.totalorder %s29_s28, 3  ;;  %s116_s30 = sadd.s32 1, %s920_s20 }
   0xf   : > { %p123_p1 = scmp.ne.s32.totalorder %s920_s20, %s916_s19  ;;  %p124_p2 = scmp.eq.s32.totalorder %s940_s25, 0 }
  0x10   : > { %s1258_s28 = smov (%p30_p0, %s29_s28), 0  ;;  %s1260_s29 = smov (!%p30_p0, %s32_s29), %s936_s24 }
  0x11   : > { %1235 = sst [smem:[#allocation10_spill]] %s1258_s28  ;;  %s113_s5 = ssub.s32 %s932_s23, %s1258_s28 }
  0x12   : > { %p1041_p3 = por %p124_p2, %p123_p1  ;;  %p34_p4 = scmp.ge.s32.totalorder %s1260_s29, 2 }
  0x13   : > { %p114_p5 = scmp.eq.s32.totalorder %s113_s5, 0  ;;  %p129_p6 = scmp.ne.s32.totalorder %s916_s19, %s912_s18 }
  0x14   : > { %p130_p7 = scmp.eq.s32.totalorder %s602_s26, 0  ;;  %s1262_s29 = smov (%p34_p4, %s1260_s29), 0 }
  0x15   : > { %1237 = sst [smem:[#allocation11_spill]] %s1262_s29  ;;  %s139_s9 = ssub.s32 %s936_s24, %s1262_s29 }
  0x16   : > { %s1049_s7 = scalar_select %p114_p5, %s920_s20, %s116_s30  }
  0x17   : > { %p1051_p8 = por %p130_p7, %p129_p6  ;;  %p140_p9 = scmp.eq.s32.totalorder %s139_s9, 0 }
  0x18   : > { %1238 = sst [smem:[#allocation12_spill]] %s1049_s7  ;;  %s142_s10 = sadd.s32 1, %s908_s17 }
  0x19   : > { %p152_p10 = scmp.ne.s32.totalorder %s908_s17, %s904_s16  ;;  %p153_p11 = scmp.eq.s32.totalorder %s602_s26, 5 }
  0x1a   : > { %s1061_s11 = scalar_select %p140_p9, %s908_s17, %s142_s10  }
  0x1b   : > { %p1063_p12 = por %p153_p11, %p152_p10  ;;  %p158_p13 = scmp.ne.s32.totalorder %s904_s16, %s900_s15 }
  0x1c   : > { %p159_p0 = scmp.eq.s32.totalorder %s603_s27, 5  ;;  %p682_p1 = scmp.lt.s32.totalorder %s940_s25, 6 }
  0x1d   : > { %s1240_s12 = scalar_select %p1063_p12, 1, 0 }
  0x1e   : > { %s204_s13 = sand.u32 1, %s920_s20   ;;  %p1071_p2 = por %p159_p0, %p158_p13 }
  0x1f   : > { %s606_s18 = sshll.u32 %s204_s13, 6  ;;  %s632_s30 = sshll.u32 %s932_s23, 10 }
  0x20   : > { %s1241_s14 = scalar_select %p1071_p2, 1, 0 }
  0x21   : > { %s1242_s3 = sld [smem:[#allocation13_spill]]  ;;  %s208_s10 = scalar_lea.vmem [#allocation2], %s606_s18 }
  0x22   : > { %s215_s29 = sshll.u32 %s208_s10, 4  ;;  %p1083_p4 = pnand %p682_p1, %p1041_p3  ;;  %s1087_s29 = int_to_ptr.vmem [resolvable:$true] %s215_s29 }
  0x23   : > { %s1089_s28 = scalar_lea.sflag [#allocation3], %s204_s13 }
  0x24   : > { %p790_p6 = pneg %p1083_p4 }
  0x27   : > { %s1079_s26 = scalar_lea.hbm %s1242_s3, %s632_s30  ;;  %s793_s30 = scalar_lea.hbm %s1242_s3, 3072 }
  0x28   : > { %s788_s5 = scalar_lea.hbm %s1079_s26, 1024  ;;  %p794_p3 = scmp.lt.u32.totalorder %s1079_s26, %s1242_s3 }
  0x29   : > { %p789_p5 = scmp.ne.s32.totalorder %s1079_s26, %s788_s5  ;;  %p795_p10 = scmp.lt.u32.totalorder %s793_s30, %s788_s5 }
  0x2a   : > { %p797_p13 = scmp.lt.u32.totalorder %s788_s5, %s1079_s26 }
  0x2b   : > { %p791_p7 = pnand %p790_p6, %p789_p5  ;;  %p796_p11 = por %p795_p10, %p794_p3 }
  0x2d   : > { %p792_p9 = pneg %p791_p7  ;;  %p798_p0 = por %p797_p13, %p796_p11 }
  0x2f   : > { %p799_p1 = pnand %p798_p0, %p792_p9 }
  0x31   : > { %802 = shalt.err (!%p799_p1)
}
  0x32   : > { %s803_s13 = scalar_lea.vmem %s1087_s29, 1024  ;;  %s942_s18 = smov [#allocation2]  }
  0x33   : > { %p804_p5 = scmp.ne.s32.totalorder %s1087_s29, %s803_s13  ;;  %s808_s6 = sshll.u32 %s942_s18, 4  ;;  %s809_s6 = int_to_ptr.vmem [resolvable:$false] %s808_s6 }
  0x34   : > { %s810_s9 = scalar_lea.vmem %s809_s6, 2048  ;;  %p811_p12 = scmp.lt.s32.totalorder %s1087_s29, %s809_s6 }
  0x35   : > { %p806_p7 = pnand %p804_p5, %p790_p6  ;;  %p812_p3 = scmp.lt.s32.totalorder %s810_s9, %s803_s13 }
  0x37   : > { %p807_p2 = pneg %p806_p7  ;;  %p813_p10 = por %p812_p3, %p811_p12 }
  0x39   : > { %p814_p11 = pnand %p813_p10, %p807_p2 }
  0x3b   : > { %817 = shalt.err (!%p814_p11)
}
  0x3c   : > { %s943_s5 = smov 64   ;;  %s944_s30 = smov 4  }
  0x3d   : > { %677 = dma.hbm_to_vmem [thread:$0]  (!%p1083_p4), %s1079_s26, 1024, %s1087_s29, %s1089_s28, %s943_s5, %s943_s5, %s944_s30  }
  0x3e   : > { %p609_p6 = scmp.ge.s32.totalorder %s940_s25, 1  ;;  %p223_p9 = scmp.lt.s32.totalorder %s940_s25, 7 }
  0x40   : > { %p224_p13 = pnand %p609_p6, %p223_p9 }
  0x41   : > { %s229_s10 = sand.u32 (!%p224_p13), 1, %s916_s19  }
  0x42   : > { %227 = sbr.rel (%p224_p13) target bundleno = 560 (0x230), region = 36  ;;  %s610_s13 = sshll.u32 (!%p224_p13), %s229_s10, 6 }
  0x43   : > { %s230_s18 = scalar_lea.sflag (!%p224_p13), [#allocation3], %s229_s10  ;;  %s1120_s6 = scalar_lea.vmem (!%p224_p13), [#allocation2], %s610_s13 }
  0x49   : > { %891 = dma.done.wait (%p1051_p8), %s230_s18, 1024  }
  0x4a   : > { %893 = vsyncadd (%p1051_p8), %s230_s18, 4294966272  ;;  %s271_s28 = sand.u32 1, %s904_s16   ;;  %p274_p12 = scmp.lt.s32.totalorder %s924_s21, 2 }
  0x4b   : > { %s611_s29 = sshll.u32 %s271_s28, 3  ;;  %p276_p2 = scmp.lt.s32.totalorder %s928_s22, 1 }
  0x4c   : > { %s275_s26 = scalar_select %p274_p12, %s924_s21, 2 }
  0x4d   : > { %s277_s27 = scalar_select %p276_p2, %s928_s22, 1 }
  0x4e   : > { %s612_s9 = sshll.u32 %s275_s26, 1  ;;  %s1139_s7 = scalar_lea.vmem [#allocation5], %s611_s29 }
  0x4f   : > { %s279_s5 = sadd.s32 %s612_s9, %s277_s27  ;;  %p616_p8 = scmp.ne.s32.totalorder %s924_s21, 0 }
  0x50   : > { %s613_s30 = sshll.u32 %s279_s5, 2  ;;  %s615_s10 = sshll.u32 %s279_s5, 3  ;;  %v945_v0 = vmov (!%p616_p8), 0.0  }
  0x51   : > { %s281_s18 = scalar_lea.vmem %s1222_s0, %s613_s30  ;;  %s289_s23 = scalar_lea.vmem %s1223_s1, %s615_s10  ;;  %295 = vst [vmem:[%s1139_s7] sm:$0xff] (!%p616_p8), %v945_v0 }
  0x52   : > { %294 = sbr.rel (%p616_p8) target bundleno = 89 (0x59), region = 44 }
  0x59 PF: > { %v779_v1 = vld [vmem:[%s1224_s2] sm:$0xff]   ;;  %v946_v2 = vmov 0.0   ;;  %vm947_vm0 = vmmov 0   ;;  %vm305_vm1 = vcmask 130048   ;;  %v948_v6 = vmov 0   ;;  %v781_v7 = vld [vmem:[%s1120_s6 + $0x8] sm:$0xff]  }
  0x5a   : > { %644 = vmatprep.subr.bf16.mxu0 %v946_v2  ;;  %v296_v3 = vld [vmem:[%s281_s18] sm:$0xf]  ;;  %650 = vmatprep.subr.bf16.mxu1 %v946_v2  ;;  %v782_v8 = vld [vmem:[%s1120_s6 + $0x10] sm:$0xff]   ;;  %v783_v9 = vld [vmem:[%s1120_s6 + $0x18] sm:$0xff]   ;;  %p627_p4 = scmp.ne.s32.totalorder %s924_s21, 2 }
  0x5b   : > { %v349_v4 = vld [vmem:[%s289_s23] sm:$0xff]  ;;  %645 = vmatpush3.bf16.msra.mxu0 %v779_v1  ;;  %646 = vmatprep.mubr.msk.bf16.mxu0 %vm947_vm0, %v946_v2  ;;  %v785_v11 = vld [vmem:[%s1120_s6 + $0x28] sm:$0xff]   ;;  %v786_v12 = vld [vmem:[%s1120_s6 + $0x30] sm:$0xff]  }
  0x5c   : > { %v780_v5 = vld [vmem:[%s1120_s6] sm:$0xff]   ;;  %778 = vset.pattern.permute.xlu0 %v948_v6  ;;  %666 = vmatprep.mubr.msk.bf16.mxu1 %vm947_vm0, %v946_v2  ;;  %v787_v13 = vld [vmem:[%s1120_s6 + $0x38] sm:$0xff]  }
  0x5d   : > { %352 = vperm.xlu0 %778, %v349_v4   ;;  %651 = vmatpush3.bf16.msra.mxu1 %v780_v5  ;;  %v784_v10 = vld [vmem:[%s1120_s6 + $0x20] sm:$0xff]  }
  0x5e   : > { %647 = vmatmul.mubr.msk.bf16.vlgmr.msra.gmra.mrb[0].mxu0 %vm305_vm1, %v296_v3  ;;  %652 = vmatprep.subr.bf16.mxu1 %v946_v2  ;;  %v356_v21 = vld [vmem:[%s1139_s7] sm:$0xff] }
  0x61   : > { %653 = vmatpush3.bf16.msra.mxu1 %v781_v7 }
  0x62   : > { %654 = vmatprep.subr.bf16.mxu1 %v946_v2 }
  0x65   : > { %655 = vmatpush3.bf16.msra.mxu1 %v782_v8 }
  0x66   : > { %656 = vmatprep.subr.bf16.mxu1 %v946_v2 }
  0x69   : > { %657 = vmatpush3.bf16.msra.mxu1 %v783_v9 }
  0x6a   : > { %658 = vmatprep.subr.bf16.mxu1 %v946_v2 }
  0x6d   : > { %659 = vmatpush3.bf16.msra.mxu1 %v784_v10 }
  0x6e   : > { %660 = vmatprep.subr.bf16.mxu1 %v946_v2 }
  0x71   : > { %661 = vmatpush3.bf16.msra.mxu1 %v785_v11 }
  0x72   : > { %662 = vmatprep.subr.bf16.mxu1 %v946_v2 }
  0x75   : > { %663 = vmatpush3.bf16.msra.mxu1 %v786_v12 }
  0x76   : > { %664 = vmatprep.subr.bf16.mxu1 %v946_v2 }
  0x79   : > { %665 = vmatpush3.bf16.msra.mxu1 %v787_v13 }
  0xdc   : > { %v353_v14 = vpop.permute.xlu0 %352 }
 0x131   : > { %v343_v15 = vpop.f32.mrb[0].mxu0 }
 0x132   : > { %v355_v16 = vmul.f32 %v353_v14, %v343_v15  ;;  %v648_v17 = vpop.f32.mrb[1].mxu0 }
 0x133   : > { %v346_v18 = vpop.f32.mrb[2].mxu0 }
 0x134   : > { %v357_v19 = vpack.c.bf16 %v355_v16, %v355_v16  ;;  %v649_v20 = vpop.f32.mrb[3].mxu0 }
 0x136   : > { %667 = vmatmul.mubr.bf16.vlgmr.msra.gmra.mrb[0].mxu1 %v357_v19 }
 0x206   : > { %467 = sbr.rel (%p627_p4) target bundleno = 535 (0x217), region = 48 }
 0x209   : > { %v456_v22 = vpop.f32.mrb[0].mxu1 }
 0x20a   : > { %v462_v23 = vadd.f32 %v456_v22, %v356_v21  ;;  %v668_v24 = vpop.f32.mrb[1].mxu1 }
 0x20b   : > { %v459_v25 = vpop.f32.mrb[2].mxu1 }
 0x20c   : > { %463 = vst [vmem:[%s1139_s7] sm:$0xff] %v462_v23  ;;  %v669_v26 = vpop.f32.mrb[3].mxu1 }
 0x213   : > { %v468_v27 = vld [vmem:[%s1139_s7] sm:$0xff] }
 0x214   : > { %v469_v28 = vmax.f32 %v468_v27, 0.0 }
 0x216   : > { %470 = vst [vmem:[%s1139_s7] sm:$0xff] %v469_v28 }
 0x217 PF: > { %s629_s3 = sshll.u32 %s928_s22, 7  ;;  %s485_s29 = sshll.u32 %s1139_s7, 4  ;;  %s486_s29 = int_to_ptr.vmem [resolvable:$true] %s485_s29 }
 0x218   : > { %s1163_s6 = scalar_lea.hbm %s1226_s4, %s629_s3  ;;  %s472_s21 = scalar_lea.sflag [#allocation4], %s271_s28 }
 0x219   : > { %s818_s9 = scalar_lea.vmem %s486_s29, 128  ;;  %p1244_p1 = scmp.ne.s32.totalorder %s1240_s12, 0 }
 0x21a   : > { %p819_p0 = scmp.ne.s32.totalorder %s486_s29, %s818_s9  ;;  %s949_s5 = smov [#allocation5]  }
 0x21b   : > { %s822_s30 = sshll.u32 %s949_s5, 4  ;;  %s823_s30 = int_to_ptr.vmem [resolvable:$false] %s822_s30 }
 0x21c   : > { %p820_p5 = pnand %p819_p0, %p1244_p1  ;;  %s824_s10 = scalar_lea.vmem %s823_s30, 256 }
 0x21d   : > { %p825_p3 = scmp.lt.s32.totalorder %s486_s29, %s823_s30  ;;  %p826_p10 = scmp.lt.s32.totalorder %s824_s10, %s818_s9 }
 0x21e   : > { %p821_p7 = pneg %p820_p5 }
 0x21f   : > { %p827_p11 = por %p826_p10, %p825_p3 }
 0x221   : > { %p828_p6 = pnand %p827_p11, %p821_p7 }
 0x223   : > { %831 = shalt.err (!%p828_p6)
}
 0x224   : > { %s832_s22 = scalar_lea.hbm %s1163_s6, 128  ;;  %s836_s13 = scalar_lea.hbm %s1226_s4, 256 }
 0x225   : > { %p833_p9 = scmp.ne.s32.totalorder %s1163_s6, %s832_s22  ;;  %p837_p2 = scmp.lt.u32.totalorder %s1163_s6, %s1226_s4 }
 0x226   : > { %p838_p8 = scmp.lt.u32.totalorder %s836_s13, %s832_s22  ;;  %p840_p0 = scmp.lt.u32.totalorder %s832_s22, %s1163_s6 }
 0x227   : > { %p834_p13 = pnand %p833_p9, %p1244_p1 }
 0x228   : > { %p839_p4 = por %p838_p8, %p837_p2 }
 0x229   : > { %p835_p12 = pneg %p834_p13 }
 0x22a   : > { %p841_p5 = por %p840_p0, %p839_p4 }
 0x22c   : > { %p842_p7 = pnand %p841_p5, %p835_p12 }
 0x22e   : > { %845 = shalt.err (!%p842_p7)
}
 0x22f   : > { %672 = dma.vmem_to_hbm [thread:$0]  (%p1244_p1), %s486_s29, 128, %s1163_s6, %s472_s21  }
 0x230 PF: > { %p683_p3 = scmp.ge.s32.totalorder %s940_s25, 2  ;;  %s497_s26 = sand.u32 1, %s900_s15  }
 0x231   : > { %p1245_p10 = scmp.ne.s32.totalorder %s1241_s14, 0  ;;  %s498_s27 = scalar_lea.sflag [#allocation4], %s497_s26 }
 0x233   : > { %p679_p11 = pnand %p683_p3, %p1245_p10 }
 0x235   : > { %895 = dma.done.wait (!%p679_p11), %s498_s27, 128  }
 0x236   : > { %897 = vsyncadd (!%p679_p11), %s498_s27, 4294967168  ;;  %s20_s25 = sadd.s32 1, %s940_s25   ;;  %s1246_s12 = sld [smem:[#allocation12_spill]] }
 0x237   : > { %p17_p6 = scmp.ge.s32.totalorder %s20_s25, 8   ;;  %s1247_s21 = sld [smem:[#allocation8_spill]] }
 0x238   : > { %s1248_s22 = sld [smem:[#allocation9_spill]]  ;;  %s1249_s23 = sld [smem:[#allocation10_spill]] }
 0x239   : > { %s1250_s24 = sld [smem:[#allocation11_spill]]  ;;  %s1251_s15 = smov %s904_s16 }
 0x23a   : > { %s1252_s16 = smov %s908_s17  ;;  %s1253_s17 = smov %s1061_s11 }
 0x23b   : > { %s1254_s18 = smov %s916_s19  ;;  %s1255_s19 = smov %s920_s20 }
 0x23c   : > { %s1256_s20 = smov %s1246_s12  ;;  %19 = sbr.rel (!%p17_p6) target bundleno = 11 (0xb), region = 95 }
 0x243   :  { %503 = vsyncpa [#allocation3], 1 }
 0x244   :  { %505 = vsyncpa [#allocation3 + $0x1], 1 }
 0x245   :  { %506 = vsyncpa [#allocation4], 1 }
 0x246   :  { %508 = vsyncpa [#allocation4 + $0x1], 1 }

</bundles_post_ra>
